<compile_context>
chip_gen: v5e
topology: v5e:2x2
jax: 0.10.0
libtpu: 0.0.40
codegen_flags: <defaults>
</compile_context>

<pallas_src>
import functools

import jax
import jax.numpy as jnp
from jax import lax
from jax.experimental import pallas as pl
from jax.experimental.pallas import tpu as pltpu

NEG_INF = -1e30                       # finite "-inf": keeps padded-column math NaN-free
VMEM_LIMIT = 48 * 1024 * 1024         # fits v7x (64 MiB/TC); raise to ~96 MiB on v5e/v6e


def _round_up(x, m):
    return (x + m - 1) // m * m


def _fused_mask_lm_kernel(x_ref, w_ref, b_ref, lab_ref,
                          logp_ref, rowsum_ref,
                          strip_ref, m_sc, l_sc, sly_sc, sy_sc,
                          *, n_rows, n_vocab, tn, tv, n_v_tiles):
    """Fused Linear -> LogSoftmax -> BCEWithLogits row sums for one token tile."""
    i = pl.program_id(0)
    k = pl.program_id(1)

    @pl.when(k == 0)
    def _():
        m_sc[...] = jnp.full_like(m_sc, NEG_INF)
        l_sc[...] = jnp.zeros_like(l_sc)
        sly_sc[...] = jnp.zeros_like(sly_sc)
        sy_sc[...] = jnp.zeros_like(sy_sc)

    # bf16 MXU operands, f32 accumulation; elementwise math stays f32 (v5e-safe).
    logits = jnp.dot(x_ref[...], w_ref[...],
                     preferred_element_type=jnp.float32) + b_ref[...]
    # In-kernel mask of the padded vocab tail (no -inf bias stream from HBM).
    col = k * tv + lax.broadcasted_iota(jnp.int32, (1, tv), 1)
    logits = jnp.where(col < n_vocab, logits, NEG_INF)
    strip_ref[k] = logits                          # VMEM stash (dynamic leading index)

    # lse-independent BCE partials, accumulated online per vocab tile.
    y = lab_ref[...].astype(jnp.float32)           # {0,1} multi-hot (exact in bf16)
    sly_sc[...] += jnp.sum(logits * y, axis=-1, keepdims=True)
    sy_sc[...] += jnp.sum(y, axis=-1, keepdims=True)

    # Flash-style online log-sum-exp statistics across vocab tiles.
    m_prev = m_sc[...]
    m_new = jnp.maximum(m_prev, jnp.max(logits, axis=-1, keepdims=True))
    l_sc[...] = (l_sc[...] * jnp.exp(m_prev - m_new)
                 + jnp.sum(jnp.exp(logits - m_new), axis=-1, keepdims=True))
    m_sc[...] = m_new

    @pl.when(k == pl.num_programs(1) - 1)
    def _():
        lse = m_sc[...] + jnp.log(l_sc[...])
        # Normalize the resident VMEM strip; emit lane-dense log-prob stores once.
        t1 = jnp.zeros((tn, 1), jnp.float32)
        for k2 in range(n_v_tiles):                # static unroll (n_v_tiles is static)
            logp_t = strip_ref[k2] - lse
            logp_ref[:, k2 * tv:(k2 + 1) * tv] = logp_t
            t1 = t1 + jnp.sum(jnp.log1p(jnp.exp(logp_t)), axis=-1, keepdims=True)
        # BCEWithLogits(x=logp<=0, y) = log1p(exp(logp)) - logp*y, so per-row sum
        # = t1 - sum(logit*y) + lse*sum(y).  Padded rows masked in-kernel.
        rows = i * tn + lax.broadcasted_iota(jnp.int32, (tn, 1), 0)
        rmask = (rows < n_rows).astype(jnp.float32)
        rowsum_ref[...] = rmask * (t1 - sly_sc[...] + lse * sy_sc[...])


def mask_lm_head(tokens, w, b, labels, *, tn=128, tv=512):
    """tokens [N,H], w [H,V], b [V], labels [N,V] -> (log_probs [N,V], loss [])."""
    N, H = tokens.shape
    V = w.shape[1]
    tn = min(tn, _round_up(N, 8))          # don't over-pad tiny problems
    tv = min(tv, _round_up(V, 128))
    n_pad = _round_up(N, tn)
    v_pad = _round_up(V, tv)
    nN, nV = n_pad // tn, v_pad // tv

    # TODO(synk): in production pre-store the LM-head weight padded and in bf16 so
    # these device-side pad/cast passes disappear entirely.
    x = jnp.zeros((n_pad, H), jnp.bfloat16).at[:N].set(tokens.astype(jnp.bfloat16))
    wp = jnp.zeros((H, v_pad), jnp.bfloat16).at[:, :V].set(w.astype(jnp.bfloat16))
    bp = jnp.zeros((1, v_pad), jnp.float32).at[:, :V].set(
        b.astype(jnp.float32)[None, :])
    lab = jnp.zeros((n_pad, v_pad), jnp.bfloat16).at[:N, :V].set(
        labels.astype(jnp.bfloat16))

    kern = functools.partial(_fused_mask_lm_kernel, n_rows=N, n_vocab=V,
                             tn=tn, tv=tv, n_v_tiles=nV)

    log_probs, rowsums = pl.pallas_call(
        kern,
        out_shape=(jax.ShapeDtypeStruct((n_pad, v_pad), jnp.float32),
                   jax.ShapeDtypeStruct((n_pad, 1), jnp.float32)),
        grid=(nN, nV),
        in_specs=[
            pl.BlockSpec((tn, H), lambda i, k: (i, 0)),     # activations
            pl.BlockSpec((H, tv), lambda i, k: (0, k)),     # weight tile (streamed)
            pl.BlockSpec((1, tv), lambda i, k: (0, k)),     # bias tile
            pl.BlockSpec((tn, tv), lambda i, k: (i, k)),    # labels tile (streamed)
        ],
        out_specs=[
            pl.BlockSpec((tn, v_pad), lambda i, k: (i, 0)),  # log-prob row strip
            pl.BlockSpec((tn, 1), lambda i, k: (i, 0)),      # BCE row sums
        ],
        scratch_shapes=[
            pltpu.VMEM((nV, tn, tv), jnp.float32),   # logits row strip (no HBM trip)
            pltpu.VMEM((tn, 1), jnp.float32),        # running max  m
            pltpu.VMEM((tn, 1), jnp.float32),        # running sum  l
            pltpu.VMEM((tn, 1), jnp.float32),        # sum(logit*y)
            pltpu.VMEM((tn, 1), jnp.float32),        # sum(y)
        ],
        compiler_params=pltpu.CompilerParams(
            dimension_semantics=("parallel", "arbitrary"),
            vmem_limit_bytes=VMEM_LIMIT),
        cost_estimate=pl.CostEstimate(
            flops=2 * n_pad * H * v_pad + 12 * n_pad * v_pad,
            transcendentals=3 * n_pad * v_pad,
            bytes_accessed=(2 * n_pad * H + 2 * H * v_pad * nN + 4 * v_pad
                            + 2 * n_pad * v_pad            # labels read
                            + 4 * n_pad * v_pad            # log-probs write
                            + 4 * n_pad)),
    )(x, wp, bp, lab)

    # mean over per-token means == sum over the [N,V] BCE matrix / (N*V)
    loss = jnp.sum(rowsums) / jnp.float32(N * V)
    return log_probs[:N, :V], loss


def language_model_forward(feature, mask_index, labels, params, *, tn=128, tv=512):
    """JAX glue mirroring LanguageModel.forward.

    feature    : [B, S, H] input to the stand-in backbone
    mask_index : [N] int32 positions in the last batch element's sequence
    labels     : [N, V] multi-hot targets
    Returns (tokens_output [N, V] log-probs, loss scalar).
    """
    # TODO(synk): the original module calls an arbitrary pretrained HF backbone
    # (self.model(**feature)[0]); replaced by a deterministic 1-layer tanh encoder
    # stand-in (plain JAX glue, not part of the kernel hot path).
    seq_out = jnp.tanh(feature @ params["w_enc"] + params["b_enc"])   # [B, S, H]
    last = seq_out[-1]                                                # [S, H]
    tokens = jnp.take(last, mask_index, axis=0)                       # [N, H]
    log_probs, loss = mask_lm_head(tokens, params["w_lm"], params["b_lm"], labels,
                                   tn=tn, tv=tv)
    return log_probs, loss


if __name__ == "__main__":
    B, S, H, V = 2, 16, 32, 512   # batch, seq, hidden_size, vocab_size
    N = 24                        # number of masked positions

    key = jax.random.PRNGKey(0)
    k_feat, k_enc, k_lm, k_lab, k_idx = jax.random.split(key, 5)

    feature = jax.random.normal(k_feat, (B, S, H), dtype=jnp.float32)
    params = {
        # stand-in backbone encoder
        "w_enc": 0.1 * jax.random.normal(k_enc, (H, H), dtype=jnp.float32),
        "b_enc": jnp.zeros((H,), dtype=jnp.float32),
        # MaskLM: nn.Linear(hidden, vocab) stored transposed as [H, V]
        "w_lm": 0.02 * jax.random.normal(k_lm, (H, V), dtype=jnp.float32),
        "b_lm": jnp.zeros((V,), dtype=jnp.float32),
    }
    mask_index = jax.random.randint(k_idx, (N,), 0, S, dtype=jnp.int32)
    labels = (jax.random.uniform(k_lab, (N, V)) > 0.5).astype(jnp.float32)

    # Small tiles only so the tiny demo still exercises a 2x2 grid; production
    # sizes should use the defaults (tn=128, tv=512+).
    tokens_output, loss = language_model_forward(
        feature, mask_index, labels, params, tn=16, tv=256)
    jax.block_until_ready((tokens_output, loss))

    assert tokens_output.shape == (N, V)
    assert loss.shape == ()

    # Pure-JAX reference (same bf16 rounding of the MXU operands).
    seq_out = jnp.tanh(feature @ params["w_enc"] + params["b_enc"])
    toks = jnp.take(seq_out[-1], mask_index, axis=0)
    xb = toks.astype(jnp.bfloat16).astype(jnp.float32)
    wb = params["w_lm"].astype(jnp.bfloat16).astype(jnp.float32)
    ref_logits = xb @ wb + params["b_lm"][None, :]
    ref_logp = jax.nn.log_softmax(ref_logits, axis=-1)
    xl = ref_logp
    ref_bce = jnp.maximum(xl, 0.0) - xl * labels + jnp.log1p(jnp.exp(-jnp.abs(xl)))
    ref_loss = jnp.mean(ref_bce)

    assert jnp.allclose(tokens_output, ref_logp, rtol=2e-3, atol=2e-3)
    assert jnp.allclose(loss, ref_loss, rtol=2e-3, atol=2e-3)
    print("KERNEL_OK")
</pallas_src>

<mosaic_0001>
module attributes {stable_mosaic.version = 11 : i64} {
  func.func @_fused_mask_lm_kernel(%arg0: i32, %arg1: i32, %arg2: memref<16x32xbf16, #tpu.memory_space<vmem>>, %arg3: memref<32x256xbf16, #tpu.memory_space<vmem>>, %arg4: memref<1x256xf32, #tpu.memory_space<vmem>>, %arg5: memref<16x256xbf16, #tpu.memory_space<vmem>>, %arg6: memref<16x512xf32, #tpu.memory_space<vmem>>, %arg7: memref<16x1xf32, #tpu.memory_space<vmem>>, %arg8: memref<2x16x256xf32, #tpu.memory_space<vmem>>, %arg9: memref<16x1xf32, #tpu.memory_space<vmem>>, %arg10: memref<16x1xf32, #tpu.memory_space<vmem>>, %arg11: memref<16x1xf32, #tpu.memory_space<vmem>>, %arg12: memref<16x1xf32, #tpu.memory_space<vmem>>) attributes {dimension_semantics = [#tpu.dimension_semantics<parallel>, #tpu.dimension_semantics<arbitrary>], iteration_bounds = array<i64: 2, 2>, scalar_prefetch = 0 : i64, scratch_operands = 5 : i64, tpu.core_type = #tpu.core_type<tc>, window_params = [{transform_indices = @transform_0, window_bounds = array<i64: 16, 32>}, {transform_indices = @transform_1, window_bounds = array<i64: 32, 256>}, {transform_indices = @transform_2, window_bounds = array<i64: 1, 256>}, {transform_indices = @transform_3, window_bounds = array<i64: 16, 256>}, {transform_indices = @transform_4, window_bounds = array<i64: 16, 512>}, {transform_indices = @transform_5, window_bounds = array<i64: 16, 1>}]} {
    %c0_i32 = arith.constant 0 : i32
    %0 = arith.cmpi eq, %arg1, %c0_i32 : i32
    %1 = arith.extui %0 : i1 to i32
    %c0_i32_0 = arith.constant 0 : i32
    %2 = arith.cmpi ne, %1, %c0_i32_0 : i32
    scf.if %2 {
      %cst_32 = arith.constant -1.000000e+30 : f32
      %55 = vector.broadcast %cst_32 : f32 to vector<16x1xf32>
      %c0_33 = arith.constant 0 : index
      %c0_34 = arith.constant 0 : index
      %56 = vector.load %arg9[%c0_33, %c0_34] : memref<16x1xf32, #tpu.memory_space<vmem>>, vector<16x1xf32>
      tpu.vector_store %arg9[%c0_33, %c0_34], %55 {strides = array<i32>} : memref<16x1xf32, #tpu.memory_space<vmem>>, vector<16x1xf32>,
      %cst_35 = arith.constant 0.000000e+00 : f32
      %57 = vector.broadcast %cst_35 : f32 to vector<16x1xf32>
      %c0_36 = arith.constant 0 : index
      %c0_37 = arith.constant 0 : index
      %58 = vector.load %arg10[%c0_36, %c0_37] : memref<16x1xf32, #tpu.memory_space<vmem>>, vector<16x1xf32>
      tpu.vector_store %arg10[%c0_36, %c0_37], %57 {strides = array<i32>} : memref<16x1xf32, #tpu.memory_space<vmem>>, vector<16x1xf32>,
      %cst_38 = arith.constant 0.000000e+00 : f32
      %59 = vector.broadcast %cst_38 : f32 to vector<16x1xf32>
      %c0_39 = arith.constant 0 : index
      %c0_40 = arith.constant 0 : index
      %60 = vector.load %arg11[%c0_39, %c0_40] : memref<16x1xf32, #tpu.memory_space<vmem>>, vector<16x1xf32>
      tpu.vector_store %arg11[%c0_39, %c0_40], %59 {strides = array<i32>} : memref<16x1xf32, #tpu.memory_space<vmem>>, vector<16x1xf32>,
      %cst_41 = arith.constant 0.000000e+00 : f32
      %61 = vector.broadcast %cst_41 : f32 to vector<16x1xf32>
      %c0_42 = arith.constant 0 : index
      %c0_43 = arith.constant 0 : index
      %62 = vector.load %arg12[%c0_42, %c0_43] : memref<16x1xf32, #tpu.memory_space<vmem>>, vector<16x1xf32>
      tpu.vector_store %arg12[%c0_42, %c0_43], %61 {strides = array<i32>} : memref<16x1xf32, #tpu.memory_space<vmem>>, vector<16x1xf32>,
    } else {
    }
    %c0 = arith.constant 0 : index
    %c0_1 = arith.constant 0 : index
    %3 = vector.load %arg2[%c0, %c0_1] : memref<16x32xbf16, #tpu.memory_space<vmem>>, vector<16x32xbf16>
    %c0_2 = arith.constant 0 : index
    %c0_3 = arith.constant 0 : index
    %4 = vector.load %arg3[%c0_2, %c0_3] : memref<32x256xbf16, #tpu.memory_space<vmem>>, vector<32x256xbf16>
    %cst = arith.constant dense<0.000000e+00> : vector<16x256xf32>
    %5 = tpu.matmul %3, %4, %cst {dimension_numbers = #tpu.dot_dimension_numbers<[1], [0], [0], [1], [0, 0, 1, 1], [], []>} : vector<16x32xbf16>, vector<32x256xbf16>, vector<16x256xf32> -> vector<16x256xf32>
    %c0_4 = arith.constant 0 : index
    %c0_5 = arith.constant 0 : index
    %6 = vector.load %arg4[%c0_4, %c0_5] : memref<1x256xf32, #tpu.memory_space<vmem>>, vector<1x256xf32>
    %7 = vector.broadcast %6 : vector<1x256xf32> to vector<16x256xf32>
    %8 = arith.addf %5, %7 : vector<16x256xf32>
    %c256_i32 = arith.constant 256 : i32
    %9 = arith.muli %arg1, %c256_i32 : i32
    %10 = tpu.iota {dimensions = array<i32: 1>} : vector<1x256xi32>
    %11 = vector.broadcast %9 : i32 to vector<1x256xi32>
    %12 = arith.addi %11, %10 : vector<1x256xi32>
    %c512_i32 = arith.constant 512 : i32
    %13 = vector.broadcast %c512_i32 : i32 to vector<1x256xi32>
    %14 = arith.cmpi slt, %12, %13 : vector<1x256xi32>
    %cst_6 = arith.constant -1.000000e+30 : f32
    %15 = vector.shape_cast %14 : vector<1x256xi1> to vector<1x256xi1>
    %16 = vector.broadcast %15 : vector<1x256xi1> to vector<16x256xi1>
    %17 = vector.broadcast %cst_6 : f32 to vector<16x256xf32>
    %18 = arith.select %16, %8, %17 : vector<16x256xi1>, vector<16x256xf32>
    %19 = arith.index_cast %arg1 : i32 to index
    %c0_7 = arith.constant 0 : index
    %c0_8 = arith.constant 0 : index
    %20 = vector.load %arg8[%19, %c0_7, %c0_8] : memref<2x16x256xf32, #tpu.memory_space<vmem>>, vector<1x16x256xf32>
    %21 = vector.shape_cast %20 : vector<1x16x256xf32> to vector<16x256xf32>
    %22 = vector.shape_cast %18 : vector<16x256xf32> to vector<1x16x256xf32>
    tpu.vector_store %arg8[%19, %c0_7, %c0_8], %22 {strides = array<i32>} : memref<2x16x256xf32, #tpu.memory_space<vmem>>, vector<1x16x256xf32>,
    %c0_9 = arith.constant 0 : index
    %c0_10 = arith.constant 0 : index
    %23 = vector.load %arg5[%c0_9, %c0_10] : memref<16x256xbf16, #tpu.memory_space<vmem>>, vector<16x256xbf16>
    %24 = arith.extf %23 : vector<16x256xbf16> to vector<16x256xf32>
    %c0_11 = arith.constant 0 : index
    %c0_12 = arith.constant 0 : index
    %25 = vector.load %arg11[%c0_11, %c0_12] : memref<16x1xf32, #tpu.memory_space<vmem>>, vector<16x1xf32>
    %26 = arith.mulf %18, %24 : vector<16x256xf32>
    %cst_13 = arith.constant dense<0.000000e+00> : vector<16xf32>
    %27 = vector.multi_reduction <add>, %26, %cst_13 [1] : vector<16x256xf32> to vector<16xf32>
    %28 = vector.shape_cast %27 : vector<16xf32> to vector<16x1xf32>
    %29 = arith.addf %25, %28 : vector<16x1xf32>
    %c0_14 = arith.constant 0 : index
    %c0_15 = arith.constant 0 : index
    %30 = vector.load %arg11[%c0_14, %c0_15] : memref<16x1xf32, #tpu.memory_space<vmem>>, vector<16x1xf32>
    tpu.vector_store %arg11[%c0_14, %c0_15], %29 {strides = array<i32>} : memref<16x1xf32, #tpu.memory_space<vmem>>, vector<16x1xf32>,
    %c0_16 = arith.constant 0 : index
    %c0_17 = arith.constant 0 : index
    %31 = vector.load %arg12[%c0_16, %c0_17] : memref<16x1xf32, #tpu.memory_space<vmem>>, vector<16x1xf32>
    %cst_18 = arith.constant dense<0.000000e+00> : vector<16xf32>
    %32 = vector.multi_reduction <add>, %24, %cst_18 [1] : vector<16x256xf32> to vector<16xf32>
    %33 = vector.shape_cast %32 : vector<16xf32> to vector<16x1xf32>
    %34 = arith.addf %31, %33 : vector<16x1xf32>
    %c0_19 = arith.constant 0 : index
    %c0_20 = arith.constant 0 : index
    %35 = vector.load %arg12[%c0_19, %c0_20] : memref<16x1xf32, #tpu.memory_space<vmem>>, vector<16x1xf32>
    tpu.vector_store %arg12[%c0_19, %c0_20], %34 {strides = array<i32>} : memref<16x1xf32, #tpu.memory_space<vmem>>, vector<16x1xf32>,
    %c0_21 = arith.constant 0 : index
    %c0_22 = arith.constant 0 : index
    %36 = vector.load %arg9[%c0_21, %c0_22] : memref<16x1xf32, #tpu.memory_space<vmem>>, vector<16x1xf32>
    %cst_23 = arith.constant dense<0xFF800000> : vector<16xf32>
    %37 = vector.multi_reduction <maximumf>, %18, %cst_23 [1] : vector<16x256xf32> to vector<16xf32>
    %38 = vector.shape_cast %37 : vector<16xf32> to vector<16x1xf32>
    %39 = arith.maximumf %36, %38 : vector<16x1xf32>
    %c0_24 = arith.constant 0 : index
    %c0_25 = arith.constant 0 : index
    %40 = vector.load %arg10[%c0_24, %c0_25] : memref<16x1xf32, #tpu.memory_space<vmem>>, vector<16x1xf32>
    %41 = arith.subf %36, %39 : vector<16x1xf32>
    %42 = math.exp %41 : vector<16x1xf32>
    %43 = arith.mulf %40, %42 : vector<16x1xf32>
    %44 = vector.broadcast %39 : vector<16x1xf32> to vector<16x256xf32>
    %45 = arith.subf %18, %44 : vector<16x256xf32>
    %46 = math.exp %45 : vector<16x256xf32>
    %cst_26 = arith.constant dense<0.000000e+00> : vector<16xf32>
    %47 = vector.multi_reduction <add>, %46, %cst_26 [1] : vector<16x256xf32> to vector<16xf32>
    %48 = vector.shape_cast %47 : vector<16xf32> to vector<16x1xf32>
    %49 = arith.addf %43, %48 : vector<16x1xf32>
    %c0_27 = arith.constant 0 : index
    %c0_28 = arith.constant 0 : index
    %50 = vector.load %arg10[%c0_27, %c0_28] : memref<16x1xf32, #tpu.memory_space<vmem>>, vector<16x1xf32>
    tpu.vector_store %arg10[%c0_27, %c0_28], %49 {strides = array<i32>} : memref<16x1xf32, #tpu.memory_space<vmem>>, vector<16x1xf32>,
    %c0_29 = arith.constant 0 : index
    %c0_30 = arith.constant 0 : index
    %51 = vector.load %arg9[%c0_29, %c0_30] : memref<16x1xf32, #tpu.memory_space<vmem>>, vector<16x1xf32>
    tpu.vector_store %arg9[%c0_29, %c0_30], %39 {strides = array<i32>} : memref<16x1xf32, #tpu.memory_space<vmem>>, vector<16x1xf32>,
    %c1_i32 = arith.constant 1 : i32
    %52 = arith.cmpi eq, %arg1, %c1_i32 : i32
    %53 = arith.extui %52 : i1 to i32
    %c0_i32_31 = arith.constant 0 : i32
    %54 = arith.cmpi ne, %53, %c0_i32_31 : i32
    scf.if %54 {
      %c0_32 = arith.constant 0 : index
      %c0_33 = arith.constant 0 : index
      %55 = vector.load %arg9[%c0_32, %c0_33] : memref<16x1xf32, #tpu.memory_space<vmem>>, vector<16x1xf32>
      %c0_34 = arith.constant 0 : index
      %c0_35 = arith.constant 0 : index
      %56 = vector.load %arg10[%c0_34, %c0_35] : memref<16x1xf32, #tpu.memory_space<vmem>>, vector<16x1xf32>
      %57 = math.log %56 : vector<16x1xf32>
      %58 = arith.addf %55, %57 : vector<16x1xf32>
      %cst_36 = arith.constant 0.000000e+00 : f32
      %59 = vector.broadcast %cst_36 : f32 to vector<16x1xf32>
      %c0_37 = arith.constant 0 : index
      %c0_38 = arith.constant 0 : index
      %c0_39 = arith.constant 0 : index
      %60 = vector.load %arg8[%c0_37, %c0_38, %c0_39] : memref<2x16x256xf32, #tpu.memory_space<vmem>>, vector<1x16x256xf32>
      %61 = vector.shape_cast %60 : vector<1x16x256xf32> to vector<16x256xf32>
      %62 = vector.broadcast %58 : vector<16x1xf32> to vector<16x256xf32>
      %63 = arith.subf %61, %62 : vector<16x256xf32>
      %c0_40 = arith.constant 0 : index
      %c0_41 = arith.constant 0 : index
      %64 = vector.load %arg6[%c0_40, %c0_41] : memref<16x512xf32, #tpu.memory_space<vmem>>, vector<16x256xf32>
      tpu.vector_store %arg6[%c0_40, %c0_41], %63 {strides = array<i32>} : memref<16x512xf32, #tpu.memory_space<vmem>>, vector<16x256xf32>,
      %65 = math.exp %63 : vector<16x256xf32>
      %66 = math.log1p %65 : vector<16x256xf32>
      %cst_42 = arith.constant dense<0.000000e+00> : vector<16xf32>
      %67 = vector.multi_reduction <add>, %66, %cst_42 [1] : vector<16x256xf32> to vector<16xf32>
      %68 = vector.shape_cast %67 : vector<16xf32> to vector<16x1xf32>
      %69 = arith.addf %59, %68 : vector<16x1xf32>
      %c1 = arith.constant 1 : index
      %c0_43 = arith.constant 0 : index
      %c0_44 = arith.constant 0 : index
      %70 = vector.load %arg8[%c1, %c0_43, %c0_44] : memref<2x16x256xf32, #tpu.memory_space<vmem>>, vector<1x16x256xf32>
      %71 = vector.shape_cast %70 : vector<1x16x256xf32> to vector<16x256xf32>
      %72 = vector.broadcast %58 : vector<16x1xf32> to vector<16x256xf32>
      %73 = arith.subf %71, %72 : vector<16x256xf32>
      %c0_45 = arith.constant 0 : index
      %c256 = arith.constant 256 : index
      %74 = vector.load %arg6[%c0_45, %c256] : memref<16x512xf32, #tpu.memory_space<vmem>>, vector<16x256xf32>
      tpu.vector_store %arg6[%c0_45, %c256], %73 {strides = array<i32>} : memref<16x512xf32, #tpu.memory_space<vmem>>, vector<16x256xf32>,
      %75 = math.exp %73 : vector<16x256xf32>
      %76 = math.log1p %75 : vector<16x256xf32>
      %cst_46 = arith.constant dense<0.000000e+00> : vector<16xf32>
      %77 = vector.multi_reduction <add>, %76, %cst_46 [1] : vector<16x256xf32> to vector<16xf32>
      %78 = vector.shape_cast %77 : vector<16xf32> to vector<16x1xf32>
      %79 = arith.addf %69, %78 : vector<16x1xf32>
      %c16_i32 = arith.constant 16 : i32
      %80 = arith.muli %arg0, %c16_i32 : i32
      %81 = tpu.iota {dimensions = array<i32: 0>} : vector<16x1xi32>
      %82 = vector.broadcast %80 : i32 to vector<16x1xi32>
      %83 = arith.addi %82, %81 : vector<16x1xi32>
      %c24_i32 = arith.constant 24 : i32
      %84 = vector.broadcast %c24_i32 : i32 to vector<16x1xi32>
      %85 = arith.cmpi slt, %83, %84 : vector<16x1xi32>
      %86 = arith.extui %85 : vector<16x1xi1> to vector<16x1xi32>
      %87 = arith.sitofp %86 : vector<16x1xi32> to vector<16x1xf32>
      %c0_47 = arith.constant 0 : index
      %c0_48 = arith.constant 0 : index
      %88 = vector.load %arg11[%c0_47, %c0_48] : memref<16x1xf32, #tpu.memory_space<vmem>>, vector<16x1xf32>
      %89 = arith.subf %79, %88 : vector<16x1xf32>
      %c0_49 = arith.constant 0 : index
      %c0_50 = arith.constant 0 : index
      %90 = vector.load %arg12[%c0_49, %c0_50] : memref<16x1xf32, #tpu.memory_space<vmem>>, vector<16x1xf32>
      %91 = arith.mulf %58, %90 : vector<16x1xf32>
      %92 = arith.addf %89, %91 : vector<16x1xf32>
      %93 = arith.mulf %87, %92 : vector<16x1xf32>
      %c0_51 = arith.constant 0 : index
      %c0_52 = arith.constant 0 : index
      %94 = vector.load %arg7[%c0_51, %c0_52] : memref<16x1xf32, #tpu.memory_space<vmem>>, vector<16x1xf32>
      tpu.vector_store %arg7[%c0_51, %c0_52], %93 {strides = array<i32>} : memref<16x1xf32, #tpu.memory_space<vmem>>, vector<16x1xf32>,
    } else {
    }
    return
  }
  func.func @transform_0(%arg0: i32, %arg1: i32) -> (i32, i32) {
    %c0_i32 = arith.constant 0 : i32
    %c0_i32_0 = arith.constant 0 : i32
    return %arg0, %c0_i32 : i32, i32
  }
  func.func @transform_1(%arg0: i32, %arg1: i32) -> (i32, i32) {
    %c0_i32 = arith.constant 0 : i32
    %c0_i32_0 = arith.constant 0 : i32
    return %c0_i32, %arg1 : i32, i32
  }
  func.func @transform_2(%arg0: i32, %arg1: i32) -> (i32, i32) {
    %c0_i32 = arith.constant 0 : i32
    %c0_i32_0 = arith.constant 0 : i32
    return %c0_i32, %arg1 : i32, i32
  }
  func.func @transform_3(%arg0: i32, %arg1: i32) -> (i32, i32) {
    %c0_i32 = arith.constant 0 : i32
    return %arg0, %arg1 : i32, i32
  }
  func.func @transform_4(%arg0: i32, %arg1: i32) -> (i32, i32) {
    %c0_i32 = arith.constant 0 : i32
    %c0_i32_0 = arith.constant 0 : i32
    return %arg0, %c0_i32 : i32, i32
  }
  func.func @transform_5(%arg0: i32, %arg1: i32) -> (i32, i32) {
    %c0_i32 = arith.constant 0 : i32
    %c0_i32_0 = arith.constant 0 : i32
    return %arg0, %c0_i32 : i32, i32
  }
}

</mosaic_0001>

<bundles_post_ra>
// kernel: tpu_custom_call.1
= control target key start
LH: loop header
LB: loop body
LE: loop exit
PB: predicated region body
PF: predicated region fallthrough
CT: control target
= control target key end

     0   :  { %s2027_s0 = inlined_call_operand.hbm [shape: bf16[32,32], index: 0, kind: input, shape index: {}]   ;;  %s2028_s1 = inlined_call_operand.hbm [shape: bf16[32,512], index: 1, kind: input, shape index: {}]   ;;  %s2029_s2 = inlined_call_operand.hbm [shape: f32[1,512], index: 2, kind: input, shape index: {}]   ;;  %s2030_s3 = inlined_call_operand.hbm [shape: bf16[32,512], index: 3, kind: input, shape index: {}]   ;;  %s2031_s4 = inlined_call_operand.hbm [shape: f32[32,512], index: 4, kind: output, shape index: {0}]   ;;  %s2032_s5 = inlined_call_operand.vmem [shape: f32[32,1], index: 5, kind: output, shape index: {1}]  }
   0x1   :  { %2054 = sst [smem:[#allocation34_spill]] %s2028_s1 }
   0x2   :  { %2055 = sst [smem:[#allocation35_spill]] %s2031_s4 }
   0x3   :  { %2056 = sst [smem:[#allocation36_spill]] %s2032_s5 }
   0x4   :  { %11 = vsyncpa [#allocation8], 0 }
   0x5   :  { %13 = vsyncpa [#allocation8 + $0x1], 0 }
   0x6   :  { %14 = vsyncpa [#allocation11], 0 }
   0x7   :  { %16 = vsyncpa [#allocation11 + $0x1], 0 }
   0x8   :  { %17 = vsyncpa [#allocation14], 0 }
   0x9   :  { %19 = vsyncpa [#allocation14 + $0x1], 0 }
   0xa   :  { %20 = vsyncpa [#allocation9], 0 }
   0xb   :  { %22 = vsyncpa [#allocation9 + $0x1], 0  ;;  %s1578_s18 = smov 0   ;;  %s1580_s19 = smov 0  }
   0xc   :  { %s1582_s20 = smov 0   ;;  %s1584_s21 = smov 0  }
   0xd   :  { %s1586_s22 = smov 0   ;;  %s1588_s23 = smov 0  }
   0xe   :  { %s1590_s24 = smov 0   ;;  %s1592_s25 = smov 0  }
   0xf   :  { %s1594_s26 = smov 0   ;;  %s1596_s27 = smov 0  }
  0x10   :  { %s1598_s28 = smov 0   ;;  %s1600_s29 = smov 0  }
  0x11   :  { %s1602_s30 = smov 0   ;;  %s1604_s6 = smov 0  }
  0x12 LB: > { %2057 = sst [smem:[#allocation20_spill]] %s1498_s22  ;;  %s37_s7 = sadd.s32 1, %s1526_s29  ;;  %s1534_s6 = sphi %s1604_s6, %s28_s6   ;;  %s1530_s30 = sphi %s1602_s30, %s2116_s30   ;;  %s1526_s29 = sphi %s1600_s29, %s2127_s29   ;;  %s1522_s28 = sphi %s1598_s28, %s2126_s28   ;;  %s1518_s27 = sphi %s1596_s27, %s2125_s27   ;;  %s1514_s26 = sphi %s1594_s26, %s2124_s26   ;;  %s1510_s25 = sphi %s1592_s25, %s2123_s25   ;;  %s1506_s24 = sphi %s1590_s24, %s2122_s24   ;;  %s1502_s23 = sphi %s1588_s23, %s2121_s23   ;;  %s1498_s22 = sphi %s1586_s22, %s2120_s22   ;;  %s1494_s21 = sphi %s1584_s21, %s2110_s21   ;;  %s1490_s20 = sphi %s1582_s20, %s2119_s20   ;;  %s1486_s19 = sphi %s1580_s19, %s2118_s19   ;;  %s1482_s18 = sphi %s1578_s18, %s2117_s18  }
  0x13   : > { %2058 = sst [smem:[#allocation21_spill]] %s1506_s24  ;;  %p2042_p0 = scmp.eq.s32.totalorder %s1534_s6, 0 }
  0x14   : > { %2059 = sst [smem:[#allocation22_spill]] %s1514_s26  ;;  %p1650_p1 = scmp.ge.s32.totalorder %s37_s7, 2 }
  0x15   : > { %2060 = sst [smem:[#allocation23_spill]] %s1518_s27  ;;  %p80_p2 = scmp.ne.s32.totalorder %s1502_s23, %s1498_s22 }
  0x16   : > { %2061 = sst [smem:[#allocation24_spill]] %s1522_s28  ;;  %s2129_s7 = smov (%p1650_p1, %s37_s7), 0 }
  0x17   : > { %2062 = sst [smem:[#allocation25_spill]] %s1530_s30  ;;  %p82_p3 = por %p80_p2, %p2042_p0 }
  0x18   : > { %2064 = sst [smem:[#allocation26_spill]] %s2129_s7  ;;  %p1083_p4 = scmp.lt.s32.totalorder %s1534_s6, 4 }
  0x19   : > { %s238_s10 = sand.u32 1, %s1534_s6   ;;  %s2034_s11 = sand.u32 1, %s1502_s23  }
  0x1a   : > { %s991_s12 = sshll.u32 %s2034_s11, 5  ;;  %s1046_s13 = sshll.u32 %s1526_s29, 3 }
  0x1b   : > { %s2065_s1 = sld [smem:[#allocation34_spill]]  ;;  %s242_s9 = scalar_lea.vmem [#allocation10], %s991_s12 }
  0x1c   : > { %s250_s4 = sshll.u32 %s242_s9, 4  ;;  %p1674_p5 = pnand %p1083_p4, %p82_p3  ;;  %s251_s4 = int_to_ptr.vmem [resolvable:$true] %s250_s4 }
  0x1d   : > { %p1001_p6 = scmp.ge.s32.totalorder %s1534_s6, 1  ;;  %s2035_s9 = smov 256  }
  0x1e   : > { %s2036_s12 = smov 128   ;;  %s2037_s14 = smov 8  }
  0x1f   : > { %p86_p7 = scmp.ne.s32.totalorder %s1498_s22, %s1494_s21  ;;  %p302_p8 = scmp.lt.s32.totalorder %s1534_s6, 5 }
  0x20   : > { %s1695_s15 = sadd.s32 4294967295, %s1534_s6   ;;  %p60_p10 = scmp.ne.s32.totalorder %s1510_s25, %s1506_s24 }
  0x21   : > { %s247_s16 = scalar_lea.hbm %s2065_s1, %s1046_s13  ;;  %s1679_s13 = scalar_lea.sflag [#allocation11], %s238_s10 }
  0x22   : > { %s248_s17 = sshll.u32 %s247_s16, 4  ;;  %p1690_p9 = pnand %p1001_p6, %p302_p8  ;;  %s249_s17 = int_to_ptr.hbm [resolvable:$true] %s248_s17 }
  0x23   : > { %1072 = dma.hbm_to_vmem [thread:$0]  (!%p1674_p5), %s249_s17, 512, %s251_s4, %s1679_s13, %s2035_s9, %s2036_s12, %s2037_s14  }
  0x24   : > { %s985_s16 = sadd.s32 4294967294, %s1534_s6   ;;  %s40_s4 = sadd.s32 1, %s1530_s30 }
  0x25   : > { %s2131_s4 = smov (!%p1650_p1, %s40_s4), %s1530_s30  ;;  %s47_s17 = sadd.s32 1, %s1514_s26 }
  0x26   : > { %p42_p11 = scmp.ge.s32.totalorder %s2131_s4, 2  ;;  %p2041_p12 = scmp.eq.s32.totalorder %s1695_s15, 0 }
  0x27   : > { %p54_p13 = scmp.ne.s32.totalorder %s1514_s26, %s1510_s25  ;;  %s1710_s9 = ssub.s32 %s1526_s29, %s2129_s7 }
  0x28   : > { %s2133_s4 = smov (%p42_p11, %s2131_s4), 0  ;;  %p1719_p1 = por %p2041_p12, %p60_p10 }
  0x29   : > { %2068 = sst [smem:[#allocation27_spill]] %s2133_s4  ;;  %p71_p2 = scmp.eq.s32.totalorder %s1710_s9, 0 }
  0x2a   : > { %s2069_s8 = scalar_select %p1719_p1, 1, 0 }
  0x2b   : > { %s1726_s12 = ssub.s32 %s1530_s30, %s2133_s4  ;;  %p1733_p3 = por %p86_p7, %p2041_p12 }
  0x2c   : > { %2070 = sst [smem:[#allocation28_spill]] %s2069_s8  ;;  %p45_p6 = scmp.eq.s32.totalorder %s1726_s12, 0 }
  0x2d   : > { %s2071_s14 = scalar_select %p1733_p3, 1, 0 }
  0x2e   : > { %p1743_p8 = por %p2042_p0, %p54_p13  ;;  %s2074_s7 = sadd.s32 1, %s1502_s23 }
  0x2f   : > { %2072 = sst [smem:[#allocation29_spill]] %s2071_s14  ;;  %p164_p7 = scmp.eq.s32.totalorder %s1695_s15, 3 }
  0x30   : > { %s1750_s27 = scalar_select %p71_p2, %s1502_s23, %s2074_s7  }
  0x31   : > { %s1753_s4 = scalar_select %p45_p6, %s1514_s26, %s47_s17  }
  0x32   : > { %2075 = sst [smem:[#allocation30_spill]] %s1750_s27  ;;  %p170_p11 = scmp.eq.s32.totalorder %s985_s16, 3 }
  0x33   : > { %2076 = sst [smem:[#allocation31_spill]] %s1753_s4  ;;  %s216_s5 = sand.u32 1, %s1514_s26  }
  0x34   : > { %p1762_p12 = por %p164_p7, %p54_p13  ;;  %p1769_p0 = por %p170_p11, %p60_p10 }
  0x35   : > { %s988_s7 = sshll.u32 %s216_s5, 3  ;;  %s1045_s27 = sshll.u32 %s1530_s30, 3 }
  0x36   : > { %s2077_s28 = scalar_select %p1762_p12, 1, 0 }
  0x37   : > { %s2079_s14 = scalar_select %p1769_p0, 1, 0 }
  0x38   : > { %2078 = sst [smem:[#allocation32_spill]] %s2077_s28  ;;  %s225_s21 = scalar_lea.hbm %s2027_s0, %s1045_s27 }
  0x39   : > { %2080 = sst [smem:[#allocation33_spill]] %s2079_s14  ;;  %s220_s22 = scalar_lea.vmem [#allocation7], %s988_s7 }
  0x3a   : > { %s228_s16 = sshll.u32 %s220_s22, 4  ;;  %s226_s8 = sshll.u32 %s225_s21, 4  ;;  %s229_s16 = int_to_ptr.vmem [resolvable:$true] %s228_s16  ;;  %s227_s8 = int_to_ptr.hbm [resolvable:$true] %s226_s8 }
  0x3b   : > { %p1067_p13 = pnand %p1083_p4, %p1743_p8  ;;  %s2081_s26 = sand.u32 1, %s1502_s23  }
  0x3c   : > { %s994_s24 = sshll.u32 %s2081_s26, 1  ;;  %s217_s14 = scalar_lea.sflag [#allocation8], %s216_s5 }
  0x3d   : > { %s1539_s30 = smov 64   ;;  %s1540_s28 = smov 4  }
  0x3e   : > { %1069 = dma.hbm_to_vmem [thread:$0]  (!%p1067_p13), %s227_s8, 128, %s229_s16, %s217_s14, %s1539_s30, %s1539_s30, %s1540_s28  }
  0x3f   : > { %s995_s22 = sshll.u32 %s1526_s29, 1  ;;  %s264_s7 = scalar_lea.vmem [#allocation12], %s994_s24 }
  0x40   : > { %s268_s1 = scalar_lea.hbm %s2029_s2, %s995_s22  ;;  %s272_s26 = sshll.u32 %s264_s7, 4  ;;  %s273_s26 = int_to_ptr.vmem [resolvable:$true] %s272_s26 }
  0x41   : > { %s270_s17 = sshll.u32 %s268_s1, 4  ;;  %s289_s5 = sadd.s32 %s1045_s27, %s995_s22  ;;  %s271_s17 = int_to_ptr.hbm [resolvable:$true] %s270_s17 }
  0x42   : > { %1075 = dma.hbm_to_vmem [thread:$0]  (!%p1674_p5), %s271_s17, 32, %s273_s26, %s1679_s13  }
  0x43   : > { %s1000_s28 = sshll.u32 %s289_s5, 2  ;;  %s2082_s16 = sor.u32 %s1710_s9, %s1726_s12 }
  0x44   : > { %s291_s8 = scalar_lea.hbm %s2030_s3, %s1000_s28  ;;  %p125_p10 = scmp.eq.s32.totalorder %s2082_s16, 0 }
  0x45   : > { %s292_s4 = sshll.u32 %s291_s8, 4  ;;  %s127_s21 = sadd.s32 1, %s1490_s20  ;;  %s293_s4 = int_to_ptr.hbm [resolvable:$true] %s292_s4 }
  0x46   : > { %p134_p2 = scmp.ne.s32.totalorder %s1490_s20, %s1486_s19  ;;  %p2083_p6 = scmp.eq.s32.totalorder %s1534_s6, 0 }
  0x47   : > { %s1800_s24 = scalar_select %p125_p10, %s1490_s20, %s127_s21  }
  0x48   : > { %p136_p8 = por %p134_p2, %p2083_p6  ;;  %p140_p7 = scmp.ne.s32.totalorder %s1486_s19, %s1482_s18 }
  0x49   : > { %s279_s1 = sand.u32 1, %s1490_s20   ;;  %p2084_p11 = scmp.eq.s32.totalorder %s1695_s15, 0 }
  0x4a   : > { %s996_s11 = sshll.u32 %s279_s1, 4  ;;  %p1076_p5 = pnand %p1083_p4, %p136_p8 }
  0x4b   : > { %p1809_p13 = por %p140_p7, %p2084_p11  ;;  %s283_s13 = scalar_lea.vmem [#allocation13], %s996_s11 }
  0x4c   : > { %s294_s9 = sshll.u32 %s283_s13, 4  ;;  %s280_s12 = scalar_lea.sflag [#allocation14], %s279_s1  ;;  %s295_s9 = int_to_ptr.vmem [resolvable:$true] %s294_s9 }
  0x4d   : > { %s2086_s22 = smov 8   ;;  %s2087_s7 = smov 128  }
  0x4e   : > { %s2088_s26 = smov 256   ;;  %306 = sbr.rel (%p1690_p9) target bundleno = 954 (0x3ba), region = 36 }
  0x4f   : > { %1078 = dma.hbm_to_vmem [thread:$0]  (!%p1076_p5), %s293_s4, 256, %s295_s9, %s280_s12, %s2088_s26, %s2087_s7, %s2086_s22  }
  0x50   : > { %s1821_s17 = sand.u32 (!%p1690_p9), 1, %s1510_s25  }
  0x51   : > { %s1002_s5 = sshll.u32 (!%p1690_p9), %s1821_s17, 3  ;;  %s309_s28 = scalar_lea.sflag (!%p1690_p9), [#allocation8], %s1821_s17 }
  0x52   : > { %s1825_s30 = scalar_lea.vmem (!%p1690_p9), [#allocation7], %s1002_s5 }
  0x53   : > { %1465 = dma.done.wait (%p1719_p1), %s309_s28, 128  }
  0x54   : > { %1467 = vsyncadd (%p1719_p1), %s309_s28, 4294967168  ;;  %s2090_s14 = sld [smem:[#allocation20_spill]]  ;;  %s318_s10 = sand.u32 1, %s1695_s15  }
  0x55   : > { %s319_s21 = scalar_lea.sflag [#allocation11], %s318_s10 }
  0x5a   : > { %s320_s16 = sand.u32 1, %s2090_s14  }
  0x5b   : > { %s1003_s4 = sshll.u32 %s320_s16, 5 }
  0x5c   : > { %s1833_s1 = scalar_lea.vmem [#allocation10], %s1003_s4 }
  0x5d   : > { %1469 = dma.done.wait (%p1733_p3), %s319_s21, 544  }
  0x5e   : > { %1471 = vsyncadd (%p1733_p3), %s319_s21, 4294966752  ;;  %s1839_s11 = sshll.u32 %s320_s16, 1  ;;  %s338_s13 = sand.u32 1, %s1486_s19  }
  0x5f   : > { %s1842_s9 = sshll.u32 %s338_s13, 4  ;;  %s332_s15 = scalar_lea.vmem [#allocation12], %s1839_s11 }
  0x60   : > { %s339_s12 = scalar_lea.sflag [#allocation14], %s338_s13  ;;  %s342_s22 = scalar_lea.vmem [#allocation13], %s1842_s9 }
  0x61   : > { %1473 = dma.done.wait (%p1809_p13), %s339_s12, 256  }
  0x62   : > { %1475 = vsyncadd (%p1809_p13), %s339_s12, 4294967040  ;;  %s2092_s7 = sld [smem:[#allocation24_spill]]  ;;  %s1006_s26 = sshll.u32 %s1821_s17, 6 }
  0x63   : > { %s2093_s8 = sld [smem:[#allocation36_spill]]  ;;  %s1857_s16 = scalar_lea.vmem [#allocation15], %s1006_s26 }
  0x64   : > { %s2094_s4 = sld [smem:[#allocation23_spill]] }
  0x68   : > { %s1007_s18 = sshll.u32 %s2092_s7, 1 }
  0x69   : > { %p397_p4 = scmp.lt.s32.totalorder %s1007_s18, 3 }
  0x6a   : > { %p1009_p9 = scmp.ne.s32.totalorder %s2094_s4, 0 }
  0x6b   : > { %s2135_s18 = smov (!%p397_p4, %s1007_s18), 3 }
  0x6c   : > { %s1008_s5 = sshll.u32 %s2135_s18, 3  ;;  %406 = sbr.rel (%p1009_p9) target bundleno = 122 (0x7a), region = 56 }
  0x6d   : > { %s1855_s10 = scalar_lea.vmem %s2093_s8, %s1008_s5 }
  0x71   : > { %vm407_vm0 = vcmask 7168   ;;  %v1541_v0 = vmov -1e+30   ;;  %v1542_v1 = vmov 0.0  }
  0x72   : > { %408 = vst.msk [vmem:[#allocation3] sm:$0xff] %vm407_vm0, %v1541_v0 }
  0x73   : > { %409 = vst.msk [vmem:[#allocation3 + $0x8] sm:$0xff] %vm407_vm0, %v1541_v0 }
  0x74   : > { %410 = vst.msk [vmem:[#allocation4] sm:$0xff] %vm407_vm0, %v1542_v1 }
  0x75   : > { %411 = vst.msk [vmem:[#allocation4 + $0x8] sm:$0xff] %vm407_vm0, %v1542_v1 }
  0x76   : > { %412 = vst.msk [vmem:[#allocation5] sm:$0xff] %vm407_vm0, %v1542_v1 }
  0x77   : > { %413 = vst.msk [vmem:[#allocation5 + $0x8] sm:$0xff] %vm407_vm0, %v1542_v1 }
  0x78   : > { %414 = vst.msk [vmem:[#allocation6] sm:$0xff] %vm407_vm0, %v1542_v1 }
  0x79   : > { %415 = vst.msk [vmem:[#allocation6 + $0x8] sm:$0xff] %vm407_vm0, %v1542_v1 }
  0x7a PF: > { %v1024_v2 = vld [vmem:[%s1833_s1 + $0x10] sm:$0xf]  ;;  %v1052_v3 = vld [vmem:[%s1833_s1 + $0x14] sm:$0xf0]  ;;  %v1051_v4 = vld [vmem:[%s1833_s1 + $0x14] sm:$0xf]  ;;  %v486_v15 = vlaneseq }
  0x7b   : > { %v1025_v5 = vor.u32 %v1052_v3, %v1024_v2  ;;  %v1026_v6 = vld [vmem:[%s1833_s1 + $0x18] sm:$0xf0]  ;;  %v1016_v7 = vld [vmem:[%s1833_s1] sm:$0xf]  ;;  %v1050_v8 = vld [vmem:[%s1833_s1 + $0x4] sm:$0xf0] }
  0x7c   : > { %s2095_s27 = sld [smem:[#allocation23_spill]]  ;;  %v1029_v9 = vor.u32 %v1051_v4, %v1026_v6  ;;  %v1049_v10 = vld [vmem:[%s1833_s1 + $0x4] sm:$0xf]  ;;  %v1018_v11 = vld [vmem:[%s1833_s1 + $0x8] sm:$0xf0]  ;;  %v1017_v12 = vor.u32 %v1050_v8, %v1016_v7  ;;  %v1048_v14 = vld [vmem:[%s1825_s30] sm:$0xff] }
  0x7d   : > { %463 = vmatpush.bf16.msra.mxu0 %v1025_v5  ;;  %v1021_v13 = vor.u32 %v1049_v10, %v1018_v11  ;;  %vm453_vm1 = vcmask 261120   ;;  %v487_v16 = vand.u32 127, %v486_v15  ;;  %v422_v19 = vld [vmem:[%s332_s15] sm:$0x3]  ;;  %v1875_v23 = vld [vmem:[%s342_s22] sm:$0xff]  ;;  %v1543_v50 = vmov 0  }
  0x7e   : > { %477 = vmatpush.bf16.msra.mxu1 %v1029_v9  ;;  %v424_v21 = vperm.slane %v422_v19, 0  ;;  %v425_v24 = vperm.slane %v422_v19, 1  ;;  %v511_v26 = vunpack.c.l.bf16 %v1875_v23  ;;  %v512_v29 = vunpack.c.h.bf16 %v1875_v23  ;;  %v510_v36 = vld [vmem:[%s342_s22 + $0x8] sm:$0xff]  ;;  %1209 = vset.pattern.permute.xlu1 %v1543_v50 }
  0x7f   : > { %v488_v18 = vadd.s32 128, %v487_v16  ;;  %v513_v39 = vunpack.c.l.bf16 %v510_v36  ;;  %v514_v42 = vunpack.c.h.bf16 %v510_v36  ;;  %1210 = vset.pattern.permute.xlu0 %v1543_v50  ;;  %v544_v51 = vld [vmem:[#allocation3] sm:$0xff]  ;;  %vm529_vm4 = vcmask 7168   ;;  %v545_v58 = vld [vmem:[#allocation3 + $0x8] sm:$0xff] }
  0x80   : > { %v515_v53 = vld [vmem:[#allocation5] sm:$0xff]  ;;  %v516_v60 = vld [vmem:[#allocation5 + $0x8] sm:$0xff]  ;;  %v534_v1 = vadd.f32 %v512_v29, %v511_v26  ;;  %v533_v23 = vld [vmem:[#allocation6 + $0x8] sm:$0xff] }
  0x81   : > { %464 = vmatpush.bf16.msra.mxu0 %v1017_v12  ;;  %v537_v2 = vadd.f32 %v514_v42, %v513_v39 }
  0x82   : > { %478 = vmatpush.bf16.msra.mxu1 %v1021_v13  ;;  %s1032_s21 = sshll.u32 %s2095_s27, 8  ;;  %s1053_s30 = sshll.u32 %s2095_s27, 5 }
  0x83   : > { %v489_v17 = vstv %s1032_s21  ;;  %s504_s1 = scalar_lea.vmem [#allocation2], %s1053_s30  ;;  %p1035_p1 = scmp.ne.s32.totalorder %s2095_s27, 1 }
  0x84   : > { %1030 = vmatmul.msk.bf16.vlgmr.msra.gmra.mxu0 %vm453_vm1, %v1048_v14  ;;  %v490_v20 = vadd.s32 %v489_v17, %v487_v16  ;;  %v491_v22 = vadd.s32 %v489_v17, %v488_v18  ;;  %s2102_s11 = sld [smem:[#allocation24_spill]] (!%p1035_p1) }
  0x85   : > { %1031 = vmatmul.msk.bf16.vlgmr.msra.gmra.mxu1 %vm453_vm1, %v1048_v14 }
  0x86   : > { %vm492_vm2 = vcmp.lt.s32.totalorder %v490_v20, 512  ;;  %vm493_vm3 = vcmp.lt.s32.totalorder %v491_v22, 512  ;;  %v532_v20 = vld [vmem:[#allocation6] sm:$0xff] }
  0x8a   : > { %s1036_s13 = sshll.u32 (!%p1035_p1), %s2102_s11, 4 }
 0x101   : > { %v466_v25 = vpop.f32.mrf.mxu0 }
 0x102   : > { %v467_v27 = vadd.f32 %v466_v25, %v424_v21  ;;  %v480_v28 = vpop.f32.mrf.mxu1 }
 0x103   : > { %v481_v30 = vadd.f32 %v480_v28, %v425_v24 }
 0x104   : > { %v498_v31 = vsel %vm492_vm2, %v467_v27, -1e+30 }
 0x105   : > { %505 = vst [vmem:[%s504_s1] sm:$0xff] %v498_v31  ;;  %v499_v32 = vsel %vm493_vm3, %v481_v30, -1e+30  ;;  %v517_v33 = vmul.f32 %v511_v26, %v498_v31 }
 0x106   : > { %506 = vst [vmem:[%s504_s1 + $0x8] sm:$0xff] %v499_v32  ;;  %v546_v34 = vmax.f32 %v498_v31, %v499_v32  ;;  %v518_v35 = vmul.f32 %v512_v29, %v499_v32  ;;  %v554_v29 = vld [vmem:[#allocation4] sm:$0xff] }
 0x108   : > { %547 = vmax.xlane.f32.xlu0 %v546_v34  ;;  %v521_v37 = vadd.f32 %v518_v35, %v517_v33  ;;  %v555_v34 = vld [vmem:[#allocation4 + $0x8] sm:$0xff] }
 0x109   : > { %v468_v38 = vpop.f32.mrf.mxu0 }
 0x10a   : > { %v469_v40 = vadd.f32 %v468_v38, %v424_v21  ;;  %v482_v41 = vpop.f32.mrf.mxu1  ;;  %522 = vadd.xlane.f32.xlu2 %v521_v37 }
 0x10b   : > { %v483_v43 = vadd.f32 %v482_v41, %v425_v24 }
 0x10c   : > { %v500_v44 = vsel %vm492_vm2, %v469_v40, -1e+30 }
 0x10d   : > { %507 = vst [vmem:[%s504_s1 + $0x10] sm:$0xff] %v500_v44  ;;  %v501_v45 = vsel %vm493_vm3, %v483_v43, -1e+30  ;;  %v519_v46 = vmul.f32 %v513_v39, %v500_v44 }
 0x10e   : > { %508 = vst [vmem:[%s504_s1 + $0x18] sm:$0xff] %v501_v45  ;;  %v549_v47 = vmax.f32 %v500_v44, %v501_v45  ;;  %v520_v48 = vmul.f32 %v514_v42, %v501_v45 }
 0x110   : > { %550 = vmax.xlane.f32.xlu0 %v549_v47  ;;  %v524_v49 = vadd.f32 %v520_v48, %v519_v46 }
 0x112   : > { %525 = vadd.xlane.f32.xlu2 %v524_v49 }
 0x118   : > { %535 = vadd.xlane.f32.xlu0 %v534_v1 }
 0x17b   : > { %v548_v52 = vpop.xlane.xlu0 %547 }
 0x17c   : > { %v552_v54 = vmax.f32 %v544_v51, %v548_v52 }
 0x17d   : > { %v523_v55 = vpop.xlane.xlu2 %522 }
 0x17e   : > { %v556_v56 = vsub.f32 %v544_v51, %v552_v54  ;;  %596 = vst.msk [vmem:[#allocation3] sm:$0xff] %vm529_vm4, %v552_v54  ;;  %v527_v57 = vadd.f32 %v523_v55, %v515_v53  ;;  %566 = vperm.xlu1 %1209, %v552_v54  }
 0x180   : > { %530 = vst.msk [vmem:[#allocation5] sm:$0xff] %vm529_vm4, %v527_v57  ;;  %v558_v26 = vmul.f32 1.442695, %v556_v56 }
 0x183   : > { %v551_v59 = vpop.xlane.xlu0 %550 }
 0x184   : > { %v553_v61 = vmax.f32 %v545_v58, %v551_v59 }
 0x185   : > { %v526_v62 = vpop.xlane.xlu2 %525 }
 0x186   : > { %v557_v63 = vsub.f32 %v545_v58, %v553_v61  ;;  %597 = vst.msk [vmem:[#allocation3 + $0x8] sm:$0xff] %vm529_vm4, %v553_v61  ;;  %v528_v0 = vadd.f32 %v526_v62, %v516_v60  ;;  %571 = vperm.xlu1 %1209, %v553_v61  }
 0x188   : > { %531 = vst.msk [vmem:[#allocation5 + $0x8] sm:$0xff] %vm529_vm4, %v528_v0  ;;  %v560_v27 = vmul.f32 1.442695, %v557_v63 }
 0x18b   : > { %v536_v21 = vpop.xlane.xlu0 %535 }
 0x18c   : > { %v540_v22 = vadd.f32 %v536_v21, %v532_v20 }
 0x18e   : > { %542 = vst.msk [vmem:[#allocation6] sm:$0xff] %vm529_vm4, %v540_v22 }
 0x1b0   : > { %538 = vadd.xlane.f32.xlu1 %v537_v2 }
 0x1f0   : > { %v567_v3 = vpop.permute.xlu1 %566 }
 0x1f1   : > { %v574_v4 = vsub.f32 %v498_v31, %v567_v3  ;;  %v575_v5 = vsub.f32 %v499_v32, %v567_v3 }
 0x1f3   : > { %v578_v6 = vmul.f32 1.442695, %v574_v4  ;;  %v580_v7 = vmul.f32 1.442695, %v575_v5 }
 0x1f5   : > { %1211 = vpow2.f32 %v578_v6 }
 0x1f6   : > { %1213 = vpow2.f32 %v580_v7 }
 0x1f8   : > { %v572_v8 = vpop.permute.xlu1 %571 }
 0x1f9   : > { %v576_v9 = vsub.f32 %v500_v44, %v572_v8  ;;  %v577_v10 = vsub.f32 %v501_v45, %v572_v8 }
 0x1fb   : > { %v1212_v11 = vpop.eup %1211  ;;  %v582_v12 = vmul.f32 1.442695, %v576_v9  ;;  %v584_v13 = vmul.f32 1.442695, %v577_v10 }
 0x1fc   : > { %v1214_v14 = vpop.eup %1213 }
 0x1fd   : > { %1215 = vpow2.f32 %v582_v12  ;;  %v586_v16 = vadd.f32 %v1214_v14, %v1212_v11 }
 0x1fe   : > { %1217 = vpow2.f32 %v584_v13 }
 0x1ff   : > { %587 = vadd.xlane.f32.xlu2 %v586_v16  ;;  %1219 = vpow2.f32 %v558_v26 }
 0x200   : > { %1221 = vpow2.f32 %v560_v27 }
 0x203   : > { %v1216_v17 = vpop.eup %1215 }
 0x204   : > { %v1218_v18 = vpop.eup %1217 }
 0x205   : > { %v589_v19 = vadd.f32 %v1218_v18, %v1216_v17  ;;  %v1220_v28 = vpop.eup %1219 }
 0x206   : > { %v562_v30 = vmul.f32 %v1220_v28, %v554_v29  ;;  %v1222_v33 = vpop.eup %1221 }
 0x207   : > { %590 = vadd.xlane.f32.xlu0 %v589_v19  ;;  %v563_v35 = vmul.f32 %v1222_v33, %v555_v34 }
 0x223   : > { %v539_v24 = vpop.xlane.xlu1 %538 }
 0x224   : > { %v541_v25 = vadd.f32 %v539_v24, %v533_v23 }
 0x226   : > { %543 = vst.msk [vmem:[#allocation6 + $0x8] sm:$0xff] %vm529_vm4, %v541_v25 }
 0x272   : > { %v588_v31 = vpop.xlane.xlu2 %587 }
 0x273   : > { %v592_v32 = vadd.f32 %v588_v31, %v562_v30 }
 0x275   : > { %594 = vst.msk [vmem:[#allocation4] sm:$0xff] %vm529_vm4, %v592_v32 }
 0x279   : > { %601 = sbr.rel (%p1035_p1) target bundleno = 932 (0x3a4), region = 60 }
 0x27a   : > { %v591_v36 = vpop.xlane.xlu0 %590 }
 0x27b   : > { %v593_v37 = vadd.f32 %v591_v36, %v563_v35 }
 0x27d   : > { %595 = vst.msk [vmem:[#allocation4 + $0x8] sm:$0xff] %vm529_vm4, %v593_v37 }
 0x27e   : > { %v604_v38 = vld [vmem:[#allocation4] sm:$0xff]  ;;  %v1544_v39 = vmov 0   ;;  %v602_v42 = vld [vmem:[#allocation3] sm:$0xff]  ;;  %v603_v47 = vld [vmem:[#allocation3 + $0x8] sm:$0xff] }
 0x27f   : > { %1223 = vset.pattern.permute.xlu0 %v1544_v39  ;;  %1224 = vlog2.f32 %v604_v38  ;;  %v612_v49 = vld [vmem:[#allocation2] sm:$0xff]  ;;  %v613_v50 = vld [vmem:[#allocation2 + $0x8] sm:$0xff]  ;;  %v614_v62 = vld [vmem:[#allocation2 + $0x10] sm:$0xff] }
 0x280   : > { %v687_v51 = vld [vmem:[#allocation2 + $0x20] sm:$0xff]  ;;  %v688_v52 = vld [vmem:[#allocation2 + $0x28] sm:$0xff]  ;;  %v615_v63 = vld [vmem:[#allocation2 + $0x18] sm:$0xff] }
 0x281   : > { %v689_v0 = vld [vmem:[#allocation2 + $0x30] sm:$0xff]  ;;  %v690_v1 = vld [vmem:[#allocation2 + $0x38] sm:$0xff] }
 0x284   : > { %v605_v40 = vld [vmem:[#allocation4 + $0x8] sm:$0xff] }
 0x285   : > { %1226 = vlog2.f32 %v605_v40  ;;  %v1225_v41 = vpop.eup %1224 }
 0x286   : > { %v607_v43 = vmul.f32 0.6931472, %v1225_v41 }
 0x288   : > { %v1895_v45 = vadd.f32 %v607_v43, %v602_v42 }
 0x28a   : > { %618 = vperm.xlu0 %1223, %v1895_v45  }
 0x28b   : > { %v1227_v44 = vpop.eup %1226 }
 0x28c   : > { %v609_v46 = vmul.f32 0.6931472, %v1227_v44 }
 0x28e   : > { %v1898_v48 = vadd.f32 %v609_v46, %v603_v47 }
 0x292   : > { %623 = vperm.xlu0 %1223, %v1898_v48  }
 0x2fc   : > { %v619_v53 = vpop.permute.xlu0 %618 }
 0x2fd   : > { %v626_v54 = vsub.f32 %v612_v49, %v619_v53  ;;  %v627_v55 = vsub.f32 %v613_v50, %v619_v53  ;;  %v691_v56 = vsub.f32 %v687_v51, %v619_v53  ;;  %v692_v57 = vsub.f32 %v688_v52, %v619_v53 }
 0x2ff   : > { %630 = vst [vmem:[%s1857_s16] sm:$0xff] %v626_v54  ;;  %v634_v58 = vmul.f32 1.442695, %v626_v54  ;;  %v636_v59 = vmul.f32 1.442695, %v627_v55  ;;  %v699_v60 = vmul.f32 1.442695, %v691_v56 }
 0x300   : > { %631 = vst [vmem:[%s1857_s16 + $0x8] sm:$0xff] %v627_v55  ;;  %v701_v61 = vmul.f32 1.442695, %v692_v57 }
 0x301   : > { %1228 = vpow2.f32 %v634_v58  ;;  %695 = vst [vmem:[%s1857_s16 + $0x10] sm:$0xff] %v691_v56 }
 0x302   : > { %1230 = vpow2.f32 %v636_v59  ;;  %696 = vst [vmem:[%s1857_s16 + $0x18] sm:$0xff] %v692_v57 }
 0x303   : > { %1232 = vpow2.f32 %v699_v60 }
 0x304   : > { %1234 = vpow2.f32 %v701_v61  ;;  %v624_v2 = vpop.permute.xlu0 %623 }
 0x305   : > { %v628_v3 = vsub.f32 %v614_v62, %v624_v2  ;;  %v629_v4 = vsub.f32 %v615_v63, %v624_v2  ;;  %v693_v5 = vsub.f32 %v689_v0, %v624_v2  ;;  %v694_v6 = vsub.f32 %v690_v1, %v624_v2 }
 0x307   : > { %v1229_v7 = vpop.eup %1228  ;;  %632 = vst [vmem:[%s1857_s16 + $0x20] sm:$0xff] %v628_v3  ;;  %v638_v8 = vmul.f32 1.442695, %v628_v3  ;;  %v640_v9 = vmul.f32 1.442695, %v629_v4 }
 0x308   : > { %v1231_v10 = vpop.eup %1230  ;;  %633 = vst [vmem:[%s1857_s16 + $0x28] sm:$0xff] %v629_v4  ;;  %v703_v11 = vmul.f32 1.442695, %v693_v5  ;;  %v705_v12 = vmul.f32 1.442695, %v694_v6  ;;  %v642_v14 = vadd.f32 1.0, %v1229_v7 }
 0x309   : > { %v1907_v13 = vpop.eup %1232  ;;  %1236 = vpow2.f32 %v638_v8  ;;  %697 = vst [vmem:[%s1857_s16 + $0x30] sm:$0xff] %v693_v5  ;;  %v651_v17 = vadd.f32 1.0, %v1231_v10  ;;  %v645_v18 = vmul.f32 -0.5, %v1229_v7  ;;  %v654_v20 = vmul.f32 -0.5, %v1231_v10 }
 0x30a   : > { %v1910_v16 = vpop.eup %1234  ;;  %1238 = vpow2.f32 %v640_v9  ;;  %698 = vst [vmem:[%s1857_s16 + $0x38] sm:$0xff] %v694_v6  ;;  %v707_v19 = vadd.f32 1.0, %v1907_v13  ;;  %v648_v22 = vand.u32 2147483647, %v1229_v7  ;;  %v657_v25 = vand.u32 2147483647, %v1231_v10 }
 0x30b   : > { %1240 = vpow2.f32 %v703_v11  ;;  %v716_v21 = vadd.f32 1.0, %v1910_v16  ;;  %v646_v24 = vadd.f32 1.0, %v645_v18  ;;  %v655_v27 = vadd.f32 1.0, %v654_v20 }
 0x30c   : > { %1242 = vpow2.f32 %v705_v12  ;;  %v710_v28 = vmul.f32 -0.5, %v1907_v13  ;;  %v713_v31 = vand.u32 2147483647, %v1907_v13  ;;  %vm1921_vm5 = vcmp.lt.f32.partialorder %v648_v22, 0.0004427343 }
 0x30d   : > { %1244 = vlog2.f32 %v642_v14  ;;  %vm1925_vm6 = vcmp.lt.f32.partialorder %v657_v25, 0.0004427343  ;;  %v719_v39 = vmul.f32 -0.5, %v1910_v16  ;;  %v647_v43 = vmul.f32 %v1229_v7, %v646_v24 }
 0x30e   : > { %1246 = vlog2.f32 %v651_v17  ;;  %v656_v44 = vmul.f32 %v1231_v10, %v655_v27  ;;  %v711_v46 = vadd.f32 1.0, %v710_v28  ;;  %vm1931_vm7 = vcmp.lt.f32.partialorder %v713_v31, 0.0004427343 }
 0x30f   : > { %v1237_v23 = vpop.eup %1236  ;;  %1248 = vlog2.f32 %v707_v19  ;;  %v720_v58 = vadd.f32 1.0, %v719_v39  ;;  %v722_v59 = vand.u32 2147483647, %v1910_v16  ;;  %v764_v39 = vld [vmem:[#allocation5] sm:$0xff] }
 0x310   : > { %v1239_v26 = vpop.eup %1238  ;;  %1250 = vlog2.f32 %v716_v21  ;;  %v660_v29 = vadd.f32 1.0, %v1237_v23  ;;  %v663_v32 = vmul.f32 -0.5, %v1237_v23  ;;  %v666_v54 = vand.u32 2147483647, %v1237_v23 }
 0x311   : > { %v1916_v30 = vpop.eup %1240  ;;  %v669_v33 = vadd.f32 1.0, %v1239_v26  ;;  %v672_v36 = vmul.f32 -0.5, %v1239_v26  ;;  %v675_v60 = vand.u32 2147483647, %v1239_v26  ;;  %v712_v6 = vmul.f32 %v1907_v13, %v711_v46 }
 0x312   : > { %v1919_v34 = vpop.eup %1242  ;;  %1252 = vlog2.f32 %v660_v29  ;;  %v725_v40 = vadd.f32 1.0, %v1916_v30  ;;  %v664_v51 = vadd.f32 1.0, %v663_v32  ;;  %v728_v63 = vmul.f32 -0.5, %v1916_v30 }
 0x313   : > { %v1245_v37 = vpop.eup %1244  ;;  %1254 = vlog2.f32 %v669_v33  ;;  %v673_v55 = vadd.f32 1.0, %v672_v36  ;;  %v734_v56 = vadd.f32 1.0, %v1919_v34  ;;  %v737_v0 = vmul.f32 -0.5, %v1919_v34 }
 0x314   : > { %v1247_v41 = vpop.eup %1246  ;;  %v644_v42 = vmul.f32 0.6931472, %v1245_v37  ;;  %1256 = vlog2.f32 %v725_v40  ;;  %v665_v5 = vmul.f32 %v1237_v23, %v664_v51  ;;  %vm667_vm8 = vcmp.lt.f32.partialorder %v666_v54, 0.0004427343  ;;  %v768_v37 = vld [vmem:[#allocation6] sm:$0xff] }
 0x315   : > { %v1249_v47 = vpop.eup %1248  ;;  %v653_v49 = vmul.f32 0.6931472, %v1247_v41  ;;  %1258 = vlog2.f32 %v734_v56  ;;  %v674_v8 = vmul.f32 %v1239_v26, %v673_v55  ;;  %v721_v10 = vmul.f32 %v1910_v16, %v720_v58 }
 0x316   : > { %v1251_v52 = vpop.eup %1250  ;;  %v650_v53 = vsel %vm1921_vm5, %v647_v43, %v644_v42  ;;  %v709_v2 = vmul.f32 0.6931472, %v1249_v47  ;;  %vm723_vm9 = vcmp.lt.f32.partialorder %v722_v59, 0.0004427343  ;;  %vm676_vm10 = vcmp.lt.f32.partialorder %v675_v60, 0.0004427343 }
 0x317   : > { %v659_v57 = vsel %vm1925_vm6, %v656_v44, %v653_v49  ;;  %v718_v3 = vmul.f32 0.6931472, %v1251_v52  ;;  %v729_v14 = vadd.f32 1.0, %v728_v63  ;;  %v731_v17 = vand.u32 2147483647, %v1916_v30  ;;  %v769_v42 = vld [vmem:[#allocation6 + $0x8] sm:$0xff] }
 0x318   : > { %v1253_v61 = vpop.eup %1252  ;;  %v678_v62 = vadd.f32 %v659_v57, %v650_v53  ;;  %v738_v18 = vadd.f32 1.0, %v737_v0  ;;  %v715_v19 = vsel %vm1931_vm7, %v712_v6, %v709_v2  ;;  %v740_v13 = vand.u32 2147483647, %v1919_v34 }
 0x319   : > { %v1255_v1 = vpop.eup %1254  ;;  %v662_v4 = vmul.f32 0.6931472, %v1253_v61  ;;  %v724_v20 = vsel %vm723_vm9, %v721_v10, %v718_v3  ;;  %v730_v25 = vmul.f32 %v1916_v30, %v729_v14  ;;  %vm732_vm11 = vcmp.lt.f32.partialorder %v731_v17, 0.0004427343 }
 0x31a   : > { %679 = vadd.xlane.f32.xlu1 %v678_v62  ;;  %v671_v7 = vmul.f32 0.6931472, %v1255_v1  ;;  %v1257_v9 = vpop.eup %1256  ;;  %v743_v24 = vadd.f32 %v724_v20, %v715_v19  ;;  %v739_v26 = vmul.f32 %v1919_v34, %v738_v18  ;;  %vm741_vm12 = vcmp.lt.f32.partialorder %v740_v13, 0.0004427343 }
 0x31b   : > { %v668_v11 = vsel %vm667_vm8, %v665_v5, %v662_v4  ;;  %v1259_v22 = vpop.eup %1258  ;;  %v727_v23 = vmul.f32 0.6931472, %v1257_v9  ;;  %v753_v32 = vshrl.u32 %v486_v15, 7  ;;  %v755_v33 = vstv %s1036_s13  ;;  %v765_v15 = vld [vmem:[#allocation5 + $0x8] sm:$0xff] }
 0x31c   : > { %v677_v12 = vsel %vm676_vm10, %v674_v8, %v671_v7  ;;  %v736_v16 = vmul.f32 0.6931472, %v1259_v22  ;;  %v770_v34 = vmul.f32 %v768_v37, %v1895_v45  ;;  %v1545_v44 = vmov 0.0  }
 0x31d   : > { %v681_v21 = vadd.f32 %v677_v12, %v668_v11  ;;  %v733_v27 = vsel %vm732_vm11, %v730_v25, %v727_v23  ;;  %v756_v35 = vadd.s32 %v755_v33, %v753_v32  ;;  %v754_v38 = vadd.s32 8, %v753_v32 }
 0x31e   : > { %v742_v28 = vsel %vm741_vm12, %v739_v26, %v736_v16  ;;  %v771_v50 = vmul.f32 %v769_v42, %v1898_v48 }
 0x31f   : > { %682 = vadd.xlane.f32.xlu2 %v681_v21  ;;  %v746_v29 = vadd.f32 %v742_v28, %v733_v27  ;;  %vm758_vm13 = vcmp.lt.s32.totalorder %v756_v35, 24  ;;  %v757_v41 = vadd.s32 %v755_v33, %v754_v38 }
 0x320   : > { %v1037_v46 = vsel %vm758_vm13, 1.0, %v1545_v44 }
 0x321   : > { %vm759_vm14 = vcmp.lt.s32.totalorder %v757_v41, 24 }
 0x322   : > { %744 = vadd.xlane.f32.xlu1 %v743_v24  ;;  %v1038_v45 = vsel %vm759_vm14, 1.0, %v1545_v44 }
 0x327   : > { %747 = vadd.xlane.f32.xlu2 %v746_v29 }
 0x38d   : > { %v680_v31 = vpop.xlane.xlu1 %679 }
 0x392   : > { %v683_v36 = vpop.xlane.xlu2 %682 }
 0x395   : > { %v745_v30 = vpop.xlane.xlu1 %744 }
 0x396   : > { %v749_v40 = vadd.f32 %v745_v30, %v680_v31 }
 0x398   : > { %v766_v43 = vsub.f32 %v749_v40, %v764_v39 }
 0x39a   : > { %v772_v47 = vadd.f32 %v770_v34, %v766_v43  ;;  %v748_v49 = vpop.xlane.xlu2 %747 }
 0x39b   : > { %v750_v51 = vadd.f32 %v748_v49, %v683_v36 }
 0x39c   : > { %v774_v52 = vmul.f32 %v1037_v46, %v772_v47 }
 0x39d   : > { %v767_v53 = vsub.f32 %v750_v51, %v765_v15 }
 0x39e   : > { %776 = vst.msk [vmem:[%s1855_s10] sm:$0xff] %vm529_vm4, %v774_v52 }
 0x39f   : > { %v773_v54 = vadd.f32 %v771_v50, %v767_v53 }
 0x3a1   : > { %v775_v55 = vmul.f32 %v1038_v45, %v773_v54 }
 0x3a3   : > { %777 = vst.msk [vmem:[%s1855_s10 + $0x8] sm:$0xff] %vm529_vm4, %v775_v55 }
 0x3a4 PF: > { %s2103_s9 = sld [smem:[#allocation24_spill]]  ;;  %s797_s28 = sshll.u32 %s1857_s16, 4  ;;  %s798_s28 = int_to_ptr.vmem [resolvable:$true] %s797_s28 }
 0x3a5   : > { %s2105_s26 = sld [smem:[#allocation35_spill]]  ;;  %s779_s8 = scalar_lea.sflag [#allocation9], %s1821_s17 }
 0x3aa   : > { %s1055_s12 = sshll.u32 %s2103_s9, 6 }
 0x3ab   : > { %s2106_s5 = smov %s2105_s26  ;;  %s796_s18 = scalar_lea.hbm %s2105_s26, %s1055_s12 }
 0x3ac   : > { %s799_s14 = sshll.u32 %s796_s18, 4  ;;  %s1400_s30 = scalar_lea.hbm %s2106_s5, 128  ;;  %s800_s14 = int_to_ptr.hbm [resolvable:$true] %s799_s14 }
 0x3ad   : > { %s1394_s4 = sshra.s32 %s800_s14, 4  ;;  %s1395_s4 = int_to_ptr.hbm [resolvable:$true] %s1394_s4 }
 0x3ae   : > { %s1396_s27 = scalar_lea.hbm %s1395_s4, 64  ;;  %p1401_p6 = scmp.lt.s32.totalorder %s1395_s4, %s2106_s5 }
 0x3af   : > { %p1397_p3 = scmp.ne.s32.totalorder %s1395_s4, %s1396_s27  ;;  %p1402_p8 = scmp.lt.s32.totalorder %s1400_s30, %s1396_s27 }
 0x3b1   : > { %p1398_p10 = pnand %p1397_p3, %p1762_p12  ;;  %p1403_p7 = por %p1402_p8, %p1401_p6 }
 0x3b3   : > { %p1399_p2 = pneg %p1398_p10 }
 0x3b5   : > { %p1404_p11 = pnand %p1403_p7, %p1399_p2 }
 0x3b7   : > { %1407 = shalt.err (!%p1404_p11)
}
 0x3b8   : > { %s1546_s17 = smov 512   ;;  %s1547_s16 = smov 32  }
 0x3b9   : > { %1064 = dma.vmem_to_hbm [thread:$0]  (%p1762_p12), %s798_s28, 1024, %s800_s14, %s779_s8, %s1546_s17, %s1546_s17, %s1547_s16  }
 0x3ba PF: > { %s2107_s13 = sld [smem:[#allocation21_spill]]  ;;  %p1084_p13 = scmp.ge.s32.totalorder %s1534_s6, 2 }
 0x3bc   : > { %p1080_p5 = pnand %p1084_p13, %p1769_p0 }
 0x3be   : > { %p1081_p4 = pneg %p1080_p5 }
 0x3c0   : > { %s818_s12 = sand.u32 1, %s2107_s13  }
 0x3c1   : > { %s819_s22 = scalar_lea.sflag [#allocation9], %s818_s12 }
 0x3c2   : > { %1477 = dma.done.wait (%p1081_p4), %s819_s22, 1024  }
 0x3c3   : > { %1479 = vsyncadd (%p1081_p4), %s819_s22, 4294966272  ;;  %s28_s6 = sadd.s32 1, %s1534_s6   ;;  %s2110_s21 = sld [smem:[#allocation20_spill]] }
 0x3c4   : > { %p1980_p9 = scmp.ge.s32.totalorder %s28_s6, 6   ;;  %s2111_s15 = sld [smem:[#allocation30_spill]] }
 0x3c5   : > { %s2112_s26 = sld [smem:[#allocation22_spill]]  ;;  %s2117_s18 = smov %s1486_s19 }
 0x3c6   : > { %s2113_s28 = sld [smem:[#allocation31_spill]]  ;;  %s2118_s19 = smov %s1490_s20 }
 0x3c7   : > { %s2114_s14 = sld [smem:[#allocation25_spill]]  ;;  %s2119_s20 = smov %s1800_s24 }
 0x3c8   : > { %s2115_s8 = sld [smem:[#allocation26_spill]]  ;;  %s2120_s22 = smov %s1502_s23 }
 0x3c9   : > { %s2116_s30 = sld [smem:[#allocation27_spill]]  ;;  %s2122_s24 = smov %s1510_s25 }
 0x3ca   : > { %s2121_s23 = smov %s2111_s15  ;;  %s2125_s27 = smov %s1526_s29 }
 0x3cb   : > { %s2123_s25 = smov %s2112_s26  ;;  %27 = sbr.rel (!%p1980_p9) target bundleno = 18 (0x12), region = 140 }
 0x3cc   : > { %s2124_s26 = smov %s2113_s28 }
 0x3cd   : > { %s2126_s28 = smov %s2114_s14 }
 0x3ce   : > { %s2127_s29 = smov %s2115_s8 }
 0x3d0   :  { %833 = vsyncpa [#allocation8], 1 }
 0x3d1   :  { %835 = vsyncpa [#allocation8 + $0x1], 1 }
 0x3d2   :  { %836 = vsyncpa [#allocation11], 1 }
 0x3d3   :  { %838 = vsyncpa [#allocation11 + $0x1], 1 }
 0x3d4   :  { %839 = vsyncpa [#allocation14], 1 }
 0x3d5   :  { %841 = vsyncpa [#allocation14 + $0x1], 1 }
 0x3d6   :  { %842 = vsyncpa [#allocation9], 1 }
 0x3d7   :  { %844 = vsyncpa [#allocation9 + $0x1], 1 }

</bundles_post_ra>
